<compile_context>
chip_gen: v6e
topology: v6e:2x2x1
jax: 0.10.0
libtpu: 0.0.40
codegen_flags: <defaults>
</compile_context>

<pallas_src>
import jax
import jax.numpy as jnp
from jax.experimental import pallas as pl
from jax.experimental.pallas import tpu as pltpu


# ---------------------------------------------------------------------------
# Kernels
# ---------------------------------------------------------------------------
def _normalize_kernel(scale_ref, x_ref, o_ref):
    """L2-normalize rows, multiply by scale, emit bf16.

    scale_ref : SMEM (1,) f32  -- exp(logit_scale) for text, 1.0 for video
    x_ref     : VMEM (rt, Dp)  f32
    o_ref     : VMEM (rt, Dp)  bf16
    """
    x = x_ref[...].astype(jnp.float32)
    ss = jnp.sum(x * x, axis=-1, keepdims=True)
    # Guard all-zero (padded) rows so they contribute clean zeros.
    # (Reference would produce NaN/Inf for genuine zero rows.)
    inv = jnp.where(ss > 0.0, jax.lax.rsqrt(ss), 0.0)
    o_ref[...] = (x * (inv * scale_ref[0])).astype(jnp.bfloat16)


def _logits_kernel(a_ref, b_ref, ab_ref, ba_ref):
    """Per-tile similarity: both outputs straight from the MXU.

    a_ref  : VMEM (tA, Dp) bf16 -- normalized rows of A (scale already folded)
    b_ref  : VMEM (tB, Dp) bf16 -- normalized rows of B
    ab_ref : VMEM (tA, tB) f32  -- (A @ B^T) block at grid (i, j)
    ba_ref : VMEM (tB, tA) f32  -- (B @ A^T) block at grid (j, i)
    """
    a = a_ref[...]
    b = b_ref[...]
    # Contract the D axis of both operands directly -- no operand transpose.
    ab_ref[...] = jax.lax.dot_general(
        a, b, dimension_numbers=(((1,), (1,)), ((), ())),
        preferred_element_type=jnp.float32)
    # Second matmul (operands swapped) instead of an in-vreg f32 transpose:
    # the MXU is idle in this HBM-bound kernel, the XLU/store path is not.
    ba_ref[...] = jax.lax.dot_general(
        b, a, dimension_numbers=(((1,), (1,)), ((), ())),
        preferred_element_type=jnp.float32)


# ---------------------------------------------------------------------------
# Wrapper
# ---------------------------------------------------------------------------
def _round_up(x, m):
    return ((x + m - 1) // m) * m


def _normalize(x_padded, scale, tile_rows):
    n_pad, dp = x_padded.shape
    return pl.pallas_call(
        _normalize_kernel,
        out_shape=jax.ShapeDtypeStruct((n_pad, dp), jnp.bfloat16),
        grid=(n_pad // tile_rows,),
        in_specs=[
            pl.BlockSpec(memory_space=pltpu.SMEM),               # scale
            pl.BlockSpec((tile_rows, dp), lambda i: (i, 0)),     # rows
        ],
        out_specs=pl.BlockSpec((tile_rows, dp), lambda i: (i, 0)),
        compiler_params=pltpu.CompilerParams(
            dimension_semantics=("parallel",)),
    )(scale, x_padded)


def _pick_tiles(n_a, n_b, dp, tile_a, tile_b):
    """Tile sizes: multiples of 128, big by default, >=2 grid points when
    possible (v7x megacore), and within a conservative VMEM budget."""
    t_a = min(tile_a, _round_up(n_a, 128))
    t_b = min(tile_b, _round_up(n_b, 128))

    def shrink(t):
        return max(128, _round_up(t // 2, 128))

    # v7x has 2 TensorCores: make sure "parallel" axes have >=2 programs.
    if pl.cdiv(n_a, t_a) * pl.cdiv(n_b, t_b) < 2:
        if n_a >= n_b and t_a > 128:
            t_a = shrink(t_a)
        elif t_b > 128:
            t_b = shrink(t_b)
        elif t_a > 128:
            t_a = shrink(t_a)

    # Keep 2x-buffered {A bf16, B bf16, AB f32, BA f32} well under the 32 MiB
    # scoped-VMEM default (valid on v5e/v6e/v7x).
    budget = 24 * 1024 * 1024
    def vmem_bytes(ta, tb):
        return 2 * (ta * dp * 2 + tb * dp * 2 + 2 * ta * tb * 4)
    while vmem_bytes(t_a, t_b) > budget and (t_a > 128 or t_b > 128):
        if t_a >= t_b and t_a > 128:
            t_a = shrink(t_a)
        else:
            t_b = shrink(t_b)
    return t_a, t_b


def clip_forward(text_features, video_features, logit_scale,
                 *, tile_t=512, tile_v=512):
    """JAX wrapper mirroring CLIP.forward -> (logits_per_text, logits_per_image)."""
    n_text, d = text_features.shape
    n_video, d2 = video_features.shape
    assert d == d2, "feature dims must match"

    # Pad D to a multiple of 128 (zero padding is neutral for norm & dot).
    dp = _round_up(d, 128)

    # exp(logit_scale) is computed once and folded into the text normalization.
    scale_t = jnp.exp(jnp.asarray(logit_scale, jnp.float32)).reshape(1)
    scale_v = jnp.ones((1,), jnp.float32)

    # Role assignment: A sits on the OUTER grid axis (its block index is
    # constant over the inner loop, so it is fetched once); B is re-streamed
    # ceil(nA/tA) times.  Put the larger matrix in the A slot.
    if n_video > n_text:
        a_raw, b_raw = video_features, text_features
        a_scale, b_scale = scale_v, scale_t
        n_a, n_b = n_video, n_text
        tile_a, tile_b = tile_v, tile_t
        a_is_text = False
    else:
        a_raw, b_raw = text_features, video_features
        a_scale, b_scale = scale_t, scale_v
        n_a, n_b = n_text, n_video
        tile_a, tile_b = tile_t, tile_v
        a_is_text = True

    t_a, t_b = _pick_tiles(n_a, n_b, dp, tile_a, tile_b)
    na_pad = _round_up(n_a, t_a)
    nb_pad = _round_up(n_b, t_b)

    a_pad = jnp.pad(a_raw, ((0, na_pad - n_a), (0, dp - d)))
    b_pad = jnp.pad(b_raw, ((0, nb_pad - n_b), (0, dp - d)))

    # 1-D normalization passes (hoisted out of the (i, j) grid), emit bf16.
    a_n = _normalize(a_pad, a_scale, t_a)
    b_n = _normalize(b_pad, b_scale, t_b)

    grid = (na_pad // t_a, nb_pad // t_b)

    out_ab, out_ba = pl.pallas_call(
        _logits_kernel,
        out_shape=(
            jax.ShapeDtypeStruct((na_pad, nb_pad), jnp.float32),  # A @ B^T
            jax.ShapeDtypeStruct((nb_pad, na_pad), jnp.float32),  # B @ A^T
        ),
        grid=grid,
        in_specs=[
            pl.BlockSpec((t_a, dp), lambda i, j: (i, 0)),   # A: constant over j
            pl.BlockSpec((t_b, dp), lambda i, j: (j, 0)),   # B: re-streamed
        ],
        out_specs=(
            pl.BlockSpec((t_a, t_b), lambda i, j: (i, j)),
            pl.BlockSpec((t_b, t_a), lambda i, j: (j, i)),
        ),
        compiler_params=pltpu.CompilerParams(
            dimension_semantics=("parallel", "parallel")),
    )(a_n, b_n)

    if a_is_text:
        lpt = out_ab[:n_text, :n_video]
        lpi = out_ba[:n_video, :n_text]
    else:
        lpi = out_ab[:n_video, :n_text]
        lpt = out_ba[:n_text, :n_video]
    return lpt, lpi


# ---------------------------------------------------------------------------
# Reference + self-test
# ---------------------------------------------------------------------------
def _reference(text_features, video_features, logit_scale):
    v = video_features / jnp.linalg.norm(video_features, axis=-1, keepdims=True)
    t = text_features / jnp.linalg.norm(text_features, axis=-1, keepdims=True)
    s = jnp.exp(logit_scale)
    logits_per_image = s * v @ t.T
    logits_per_text = s * t @ v.T
    return logits_per_text, logits_per_image


def _check(n_text, n_video, d, key, logit_scale, atol, rtol):
    k_t, k_v = jax.random.split(key)
    tf = jax.random.normal(k_t, (n_text, d), dtype=jnp.float32)
    vf = jax.random.normal(k_v, (n_video, d), dtype=jnp.float32)
    lpt, lpi = clip_forward(tf, vf, logit_scale)
    jax.block_until_ready((lpt, lpi))
    ref_lpt, ref_lpi = _reference(tf, vf, logit_scale)
    assert lpt.shape == (n_text, n_video) and lpi.shape == (n_video, n_text)
    assert jnp.allclose(lpt, ref_lpt, atol=atol, rtol=rtol)
    assert jnp.allclose(lpi, ref_lpi, atol=atol, rtol=rtol)


if __name__ == "__main__":
    key = jax.random.PRNGKey(0)

    # nn.Parameter(torch.ones([])) -> scalar 1.0.
    logit_scale = jnp.ones((), dtype=jnp.float32)

    # bf16 MXU inputs with f32 accumulation -> relaxed tolerance vs f32 ref.
    ATOL = 3e-2
    RTOL = 3e-2

    # Case 1: small, asymmetric shapes (exercises row padding to 128 tiles).
    _check(8, 24, 128, key, logit_scale, ATOL, RTOL)

    # Case 2: multi-block grid, ragged sizes, non-128-multiple D
    # (exercises D padding, tile shrink for >=2 grid programs, (j,i) writes).
    _check(300, 200, 160, jax.random.PRNGKey(1), logit_scale, ATOL, RTOL)

    # Case 3: video larger than text (exercises the A/B role swap so the
    # larger matrix sits on the outer, non-re-streamed axis).
    _check(40, 300, 96, jax.random.PRNGKey(2), logit_scale, ATOL, RTOL)

    print("KERNEL_OK")
</pallas_src>

<mosaic_0001>
module attributes {stable_mosaic.version = 11 : i64} {
  func.func @_normalize_kernel(%arg0: i32, %arg1: memref<1xf32, #tpu.memory_space<smem>>, %arg2: memref<128x128xf32, #tpu.memory_space<vmem>>, %arg3: memref<128x128xbf16, #tpu.memory_space<vmem>>) attributes {dimension_semantics = [#tpu.dimension_semantics<parallel>], iteration_bounds = array<i64: 1>, scalar_prefetch = 0 : i64, scratch_operands = 0 : i64, tpu.core_type = #tpu.core_type<tc>, window_params = [{transform_indices = @transform_0, window_bounds = array<i64: 1>}, {transform_indices = @transform_1, window_bounds = array<i64: 128, 128>}, {transform_indices = @transform_2, window_bounds = array<i64: 128, 128>}]} {
    %c0 = arith.constant 0 : index
    %c0_0 = arith.constant 0 : index
    %0 = vector.load %arg2[%c0, %c0_0] : memref<128x128xf32, #tpu.memory_space<vmem>>, vector<128x128xf32>
    %1 = arith.mulf %0, %0 : vector<128x128xf32>
    %cst = arith.constant dense<0.000000e+00> : vector<128xf32>
    %2 = vector.multi_reduction <add>, %1, %cst [1] : vector<128x128xf32> to vector<128xf32>
    %3 = vector.shape_cast %2 : vector<128xf32> to vector<128x1xf32>
    %cst_1 = arith.constant 0.000000e+00 : f32
    %4 = vector.broadcast %cst_1 : f32 to vector<128x1xf32>
    %5 = arith.cmpf ogt, %3, %4 : vector<128x1xf32>
    %6 = math.rsqrt %3 : vector<128x1xf32>
    %cst_2 = arith.constant 0.000000e+00 : f32
    %7 = vector.broadcast %cst_2 : f32 to vector<128x1xf32>
    %8 = arith.select %5, %6, %7 : vector<128x1xi1>, vector<128x1xf32>
    %c0_3 = arith.constant 0 : index
    %9 = memref.load %arg1[%c0_3] : memref<1xf32, #tpu.memory_space<smem>>
    %10 = vector.broadcast %9 : f32 to vector<128x1xf32>
    %11 = arith.mulf %8, %10 : vector<128x1xf32>
    %12 = vector.broadcast %11 : vector<128x1xf32> to vector<128x128xf32>
    %13 = arith.mulf %0, %12 : vector<128x128xf32>
    %14 = arith.truncf %13 : vector<128x128xf32> to vector<128x128xbf16>
    %c0_4 = arith.constant 0 : index
    %c0_5 = arith.constant 0 : index
    %15 = vector.load %arg3[%c0_4, %c0_5] : memref<128x128xbf16, #tpu.memory_space<vmem>>, vector<128x128xbf16>
    tpu.vector_store %arg3[%c0_4, %c0_5], %14 {strides = array<i32>} : memref<128x128xbf16, #tpu.memory_space<vmem>>, vector<128x128xbf16>,
    return
  }
  func.func @transform_0(%arg0: i32) -> i32 {
    %c0_i32 = arith.constant 0 : i32
    %c0_i32_0 = arith.constant 0 : i32
    return %c0_i32 : i32
  }
  func.func @transform_1(%arg0: i32) -> (i32, i32) {
    %c0_i32 = arith.constant 0 : i32
    %c0_i32_0 = arith.constant 0 : i32
    return %arg0, %c0_i32 : i32, i32
  }
  func.func @transform_2(%arg0: i32) -> (i32, i32) {
    %c0_i32 = arith.constant 0 : i32
    %c0_i32_0 = arith.constant 0 : i32
    return %arg0, %c0_i32 : i32, i32
  }
}

</mosaic_0001>

<bundles_post_ra>
// kernel: tpu_custom_call.1
= control target key start
LH: loop header
LB: loop body
LE: loop exit
PB: predicated region body
PF: predicated region fallthrough
CT: control target
= control target key end

     0   :  { %8 = vsyncpa [#allocation4], 0  ;;  %s559_s0 = inlined_call_operand.<no memory space> [shape: f32[1], index: 0, kind: input, shape index: {}]   ;;  %s560_s1 = inlined_call_operand.hbm [shape: f32[128,128], index: 1, kind: input, shape index: {}]   ;;  %s561_s2 = inlined_call_operand.hbm [shape: bf16[128,128], index: 2, kind: output, shape index: {}]  }
   0x1   :  { %9 = vsyncpa [#allocation5], 0  ;;  %s431_s9 = smov [#allocation3]  }
   0x2   :  { %s17_s10 = sshll.u32 %s431_s9, 4  ;;  %s18_s10 = int_to_ptr.vmem [resolvable:$true] %s17_s10 }
   0x3   :  { %s395_s11 = scalar_lea.vmem %s18_s10, 2048  ;;  %p400_p1 = scmp.lt.s32.totalorder %s18_s10, %s18_s10 }
   0x4   :  { %p396_p0 = scmp.ne.s32.totalorder %s18_s10, %s395_s11  ;;  %p401_p2 = scmp.lt.s32.totalorder %s395_s11, %s395_s11 }
   0x6   :  { %p402_p3 = por %p401_p2, %p400_p1 }
   0x8   :  { %p403_p4 = pnand %p402_p3, %p396_p0 }
   0xa   :  { %406 = shalt.err (!%p403_p4)
}
   0xb   :  { %s432_s12 = smov 128   ;;  %s433_s13 = smov 8  }
   0xc   :  { %23 = dma.hbm_to_vmem [thread:$0]  %s560_s1, 2048, %s18_s10, [#allocation4], %s432_s12, %s432_s12, %s433_s13  }
   0xd   :  { %427 = dma.done.wait [#allocation4], 2048  }
   0xe   :  { %428 = vsyncadd [#allocation4], 4294965248  ;;  %v455_v0 = vld [vmem:[#allocation3 + $0x10] sm:$0xff]  ;;  %v457_v1 = vld [vmem:[#allocation3] sm:$0xff]  ;;  %v522_v42 = vstv %s559_s0  ;;  %s434_s0 = smov [#allocation6]  }
   0xf   :  { %v459_v2 = vld [vmem:[#allocation3 + $0x18] sm:$0xff]  ;;  %v45_v3 = vmul.f32 %v455_v0, %v455_v0  ;;  %v43_v4 = vmul.f32 %v457_v1, %v457_v1  ;;  %v465_v5 = vld [vmem:[#allocation3 + $0x8] sm:$0xff]  ;;  %v473_v9 = vld [vmem:[#allocation3 + $0x20] sm:$0xff]  ;;  %s258_s17 = sshll.u32 %s434_s0, 4  ;;  %s259_s17 = int_to_ptr.vmem [resolvable:$true] %s258_s17 }
  0x10   :  { %v46_v6 = vmul.f32 %v459_v2, %v459_v2  ;;  %v44_v7 = vmul.f32 %v465_v5, %v465_v5  ;;  %v471_v8 = vld [vmem:[#allocation3 + $0x28] sm:$0xff]  ;;  %v47_v11 = vmul.f32 %v473_v9, %v473_v9  ;;  %v479_v12 = vld [vmem:[#allocation3 + $0x38] sm:$0xff]  ;;  %v481_v13 = vld [vmem:[#allocation3 + $0x30] sm:$0xff]  ;;  %s407_s18 = scalar_lea.vmem %s259_s17, 1024  ;;  %p412_p6 = scmp.lt.s32.totalorder %s259_s17, %s259_s17 }
  0x11   :  { %63 = vadd.xlane.f32.xlu1 %v45_v3  ;;  %59 = vadd.xlane.f32.xlu0 %v43_v4  ;;  %v48_v10 = vmul.f32 %v471_v8, %v471_v8  ;;  %v50_v14 = vmul.f32 %v479_v12, %v479_v12  ;;  %v49_v15 = vmul.f32 %v481_v13, %v481_v13  ;;  %v487_v16 = vld [vmem:[#allocation3 + $0x48] sm:$0xff]  ;;  %v489_v17 = vld [vmem:[#allocation3 + $0x40] sm:$0xff]  ;;  %v495_v20 = vld [vmem:[#allocation3 + $0x58] sm:$0xff]  ;;  %p408_p5 = scmp.ne.s32.totalorder %s259_s17, %s407_s18  ;;  %p413_p7 = scmp.lt.s32.totalorder %s407_s18, %s407_s18 }
  0x12   :  { %v52_v18 = vmul.f32 %v487_v16, %v487_v16  ;;  %v51_v19 = vmul.f32 %v489_v17, %v489_v17  ;;  %v497_v21 = vld [vmem:[#allocation3 + $0x50] sm:$0xff]  ;;  %v54_v22 = vmul.f32 %v495_v20, %v495_v20  ;;  %v503_v24 = vld [vmem:[#allocation3 + $0x68] sm:$0xff]  ;;  %v505_v25 = vld [vmem:[#allocation3 + $0x60] sm:$0xff] }
  0x13   :  { %v53_v23 = vmul.f32 %v497_v21, %v497_v21  ;;  %v56_v26 = vmul.f32 %v503_v24, %v503_v24  ;;  %v55_v27 = vmul.f32 %v505_v25, %v505_v25  ;;  %v511_v28 = vld [vmem:[#allocation3 + $0x78] sm:$0xff]  ;;  %v513_v29 = vld [vmem:[#allocation3 + $0x70] sm:$0xff]  ;;  %p414_p8 = por %p413_p7, %p412_p6 }
  0x14   :  { %v58_v30 = vmul.f32 %v511_v28, %v511_v28  ;;  %v57_v31 = vmul.f32 %v513_v29, %v513_v29 }
  0x15   :  { %65 = vadd.xlane.f32.xlu1 %v46_v6  ;;  %61 = vadd.xlane.f32.xlu0 %v44_v7  ;;  %p415_p9 = pnand %p414_p8, %p408_p5 }
  0x19   :  { %69 = vadd.xlane.f32.xlu1 %v48_v10  ;;  %67 = vadd.xlane.f32.xlu0 %v47_v11 }
  0x1d   :  { %73 = vadd.xlane.f32.xlu1 %v50_v14  ;;  %71 = vadd.xlane.f32.xlu0 %v49_v15 }
  0x21   :  { %77 = vadd.xlane.f32.xlu1 %v52_v18  ;;  %75 = vadd.xlane.f32.xlu0 %v51_v19 }
  0x25   :  { %81 = vadd.xlane.f32.xlu1 %v54_v22  ;;  %79 = vadd.xlane.f32.xlu0 %v53_v23 }
  0x29   :  { %85 = vadd.xlane.f32.xlu1 %v56_v26  ;;  %83 = vadd.xlane.f32.xlu0 %v55_v27 }
  0x2d   :  { %89 = vadd.xlane.f32.xlu1 %v58_v30  ;;  %87 = vadd.xlane.f32.xlu0 %v57_v31 }
  0x9a   :  { %v64_v32 = vpop.xlane.xlu1 %63  ;;  %v60_v33 = vpop.xlane.xlu0 %59 }
  0x9b   :  { %355 = vrsqrt.f32 %v64_v32  ;;  %vm93_vm0 = vcmp.gt.f32.partialorder %v64_v32, 0.0  ;;  %vm91_vm1 = vcmp.gt.f32.partialorder %v60_v33, 0.0 }
  0x9c   :  { %357 = vrsqrt.f32 %v60_v33 }
  0x9e   :  { %v66_v34 = vpop.xlane.xlu1 %65  ;;  %v62_v35 = vpop.xlane.xlu0 %61 }
  0x9f   :  { %359 = vrsqrt.f32 %v66_v34  ;;  %vm94_vm2 = vcmp.gt.f32.partialorder %v66_v34, 0.0  ;;  %vm92_vm3 = vcmp.gt.f32.partialorder %v62_v35, 0.0 }
  0xa0   :  { %361 = vrsqrt.f32 %v62_v35 }
  0xa2   :  { %v70_v36 = vpop.xlane.xlu1 %69  ;;  %v68_v37 = vpop.xlane.xlu0 %67 }
  0xa3   :  { %363 = vrsqrt.f32 %v70_v36  ;;  %vm96_vm4 = vcmp.gt.f32.partialorder %v70_v36, 0.0  ;;  %vm95_vm5 = vcmp.gt.f32.partialorder %v68_v37, 0.0 }
  0xa4   :  { %365 = vrsqrt.f32 %v68_v37 }
  0xa6   :  { %v74_v38 = vpop.xlane.xlu1 %73  ;;  %v72_v39 = vpop.xlane.xlu0 %71 }
  0xa7   :  { %367 = vrsqrt.f32 %v74_v38  ;;  %vm98_vm6 = vcmp.gt.f32.partialorder %v74_v38, 0.0  ;;  %vm97_vm7 = vcmp.gt.f32.partialorder %v72_v39, 0.0 }
  0xa8   :  { %v356_v40 = vpop.eup %355  ;;  %369 = vrsqrt.f32 %v72_v39 }
  0xa9   :  { %v358_v41 = vpop.eup %357  ;;  %v125_v43 = vsel %vm93_vm0, %v356_v40, 0.0 }
  0xaa   :  { %v123_v44 = vsel %vm91_vm1, %v358_v41, 0.0  ;;  %v78_v45 = vpop.xlane.xlu1 %77  ;;  %v76_v46 = vpop.xlane.xlu0 %75  ;;  %v143_v48 = vmul.f32 %v522_v42, %v125_v43 }
  0xab   :  { %371 = vrsqrt.f32 %v78_v45  ;;  %v141_v50 = vmul.f32 %v522_v42, %v123_v44  ;;  %vm100_vm8 = vcmp.gt.f32.partialorder %v78_v45, 0.0  ;;  %vm99_vm9 = vcmp.gt.f32.partialorder %v76_v46, 0.0 }
  0xac   :  { %v360_v47 = vpop.eup %359  ;;  %373 = vrsqrt.f32 %v76_v46  ;;  %v159_v58 = vmul.f32 %v143_v48, %v455_v0 }
  0xad   :  { %v362_v49 = vpop.eup %361  ;;  %v126_v51 = vsel %vm94_vm2, %v360_v47, 0.0  ;;  %v157_v61 = vmul.f32 %v141_v50, %v457_v1 }
  0xae   :  { %v144_v52 = vmul.f32 %v522_v42, %v126_v51  ;;  %v124_v53 = vsel %vm92_vm3, %v362_v49, 0.0  ;;  %v82_v54 = vpop.xlane.xlu1 %81  ;;  %v80_v55 = vpop.xlane.xlu0 %79 }
  0xaf   :  { %v142_v56 = vmul.f32 %v522_v42, %v124_v53  ;;  %375 = vrsqrt.f32 %v82_v54  ;;  %vm102_vm10 = vcmp.gt.f32.partialorder %v82_v54, 0.0  ;;  %vm101_vm11 = vcmp.gt.f32.partialorder %v80_v55, 0.0 }
  0xb0   :  { %v364_v57 = vpop.eup %363  ;;  %v160_v59 = vmul.f32 %v144_v52, %v459_v2  ;;  %377 = vrsqrt.f32 %v80_v55 }
  0xb1   :  { %v366_v60 = vpop.eup %365  ;;  %v158_v62 = vmul.f32 %v142_v56, %v465_v5  ;;  %v128_v63 = vsel %vm96_vm4, %v364_v57, 0.0 }
  0xb2   :  { %v310_v3 = vpack.c.bf16 %v160_v59, %v159_v58  ;;  %v146_v4 = vmul.f32 %v522_v42, %v128_v63  ;;  %v127_v6 = vsel %vm95_vm5, %v366_v60, 0.0  ;;  %v86_v7 = vpop.xlane.xlu1 %85  ;;  %v84_v10 = vpop.xlane.xlu0 %83 }
  0xb3   :  { %v305_v11 = vpack.c.bf16 %v158_v62, %v157_v61  ;;  %v145_v0 = vmul.f32 %v522_v42, %v127_v6  ;;  %379 = vrsqrt.f32 %v86_v7  ;;  %vm104_vm12 = vcmp.gt.f32.partialorder %v86_v7, 0.0 }
  0xb4   :  { %v368_v2 = vpop.eup %367  ;;  %342 = vst [vmem:[#allocation6 + $0x8] sm:$0xff] %v310_v3   ;;  %v162_v14 = vmul.f32 %v146_v4, %v471_v8  ;;  %381 = vrsqrt.f32 %v84_v10  ;;  %vm103_vm13 = vcmp.gt.f32.partialorder %v84_v10, 0.0 }
  0xb5   :  { %v370_v1 = vpop.eup %369  ;;  %306 = vst [vmem:[#allocation6] sm:$0xff] %v305_v11   ;;  %v161_v5 = vmul.f32 %v145_v0, %v473_v9  ;;  %v130_v15 = vsel %vm98_vm6, %v368_v2, 0.0 }
  0xb6   :  { %v148_v18 = vmul.f32 %v522_v42, %v130_v15  ;;  %v129_v19 = vsel %vm97_vm7, %v370_v1, 0.0  ;;  %v90_v22 = vpop.xlane.xlu1 %89  ;;  %v88_v23 = vpop.xlane.xlu0 %87 }
  0xb7   :  { %v315_v26 = vpack.c.bf16 %v162_v14, %v161_v5  ;;  %v147_v27 = vmul.f32 %v522_v42, %v129_v19  ;;  %383 = vrsqrt.f32 %v90_v22  ;;  %vm106_vm14 = vcmp.gt.f32.partialorder %v90_v22, 0.0 }
  0xb8   :  { %v372_v30 = vpop.eup %371  ;;  %v164_v8 = vmul.f32 %v148_v18, %v479_v12  ;;  %385 = vrsqrt.f32 %v88_v23  ;;  %vm105_vm15 = vcmp.gt.f32.partialorder %v88_v23, 0.0 }
  0xb9   :  { %v374_v31 = vpop.eup %373  ;;  %343 = vst [vmem:[#allocation6 + $0x10] sm:$0xff] %v315_v26   ;;  %v163_v9 = vmul.f32 %v147_v27, %v481_v13  ;;  %v132_v32 = vsel %vm100_vm8, %v372_v30, 0.0 }
  0xba   :  { %v150_v33 = vmul.f32 %v522_v42, %v132_v32  ;;  %v131_v34 = vsel %vm99_vm9, %v374_v31, 0.0 }
  0xbb   :  { %v320_v35 = vpack.c.bf16 %v164_v8, %v163_v9  ;;  %v149_v36 = vmul.f32 %v522_v42, %v131_v34 }
  0xbc   :  { %v376_v37 = vpop.eup %375  ;;  %v166_v38 = vmul.f32 %v150_v33, %v487_v16 }
  0xbd   :  { %v378_v39 = vpop.eup %377  ;;  %344 = vst [vmem:[#allocation6 + $0x18] sm:$0xff] %v320_v35   ;;  %v165_v12 = vmul.f32 %v149_v36, %v489_v17  ;;  %v134_v40 = vsel %vm102_vm10, %v376_v37, 0.0 }
  0xbe   :  { %v152_v13 = vmul.f32 %v522_v42, %v134_v40  ;;  %v133_v41 = vsel %vm101_vm11, %v378_v39, 0.0 }
  0xbf   :  { %v325_v43 = vpack.c.bf16 %v166_v38, %v165_v12  ;;  %v151_v44 = vmul.f32 %v522_v42, %v133_v41 }
  0xc0   :  { %v380_v45 = vpop.eup %379  ;;  %v168_v46 = vmul.f32 %v152_v13, %v495_v20 }
  0xc1   :  { %v382_v47 = vpop.eup %381  ;;  %345 = vst [vmem:[#allocation6 + $0x20] sm:$0xff] %v325_v43   ;;  %v167_v16 = vmul.f32 %v151_v44, %v497_v21  ;;  %v136_v48 = vsel %vm104_vm12, %v380_v45, 0.0 }
  0xc2   :  { %v154_v17 = vmul.f32 %v522_v42, %v136_v48  ;;  %v135_v49 = vsel %vm103_vm13, %v382_v47, 0.0 }
  0xc3   :  { %v330_v50 = vpack.c.bf16 %v168_v46, %v167_v16  ;;  %v153_v51 = vmul.f32 %v522_v42, %v135_v49 }
  0xc4   :  { %v384_v52 = vpop.eup %383  ;;  %v170_v53 = vmul.f32 %v154_v17, %v503_v24 }
  0xc5   :  { %v386_v54 = vpop.eup %385  ;;  %346 = vst [vmem:[#allocation6 + $0x28] sm:$0xff] %v330_v50   ;;  %v169_v20 = vmul.f32 %v153_v51, %v505_v25  ;;  %v138_v55 = vsel %vm106_vm14, %v384_v52, 0.0 }
  0xc6   :  { %v156_v21 = vmul.f32 %v522_v42, %v138_v55  ;;  %v137_v56 = vsel %vm105_vm15, %v386_v54, 0.0 }
  0xc7   :  { %v335_v57 = vpack.c.bf16 %v170_v53, %v169_v20  ;;  %v155_v58 = vmul.f32 %v522_v42, %v137_v56 }
  0xc8   :  { %v172_v59 = vmul.f32 %v156_v21, %v511_v28 }
  0xc9   :  { %347 = vst [vmem:[#allocation6 + $0x30] sm:$0xff] %v335_v57   ;;  %v171_v24 = vmul.f32 %v155_v58, %v513_v29 }
  0xcb   :  { %v340_v60 = vpack.c.bf16 %v172_v59, %v171_v24 }
  0xcd   :  { %348 = vst [vmem:[#allocation6 + $0x38] sm:$0xff] %v340_v60  }
  0xce   :  { %418 = shalt.err (!%p415_p9)
}
  0xcf   :  { %s435_s19 = smov 64   ;;  %s436_s20 = smov 4  }
  0xd0   :  { %264 = dma.vmem_to_hbm [thread:$0]  %s259_s17, 1024, %s561_s2, [#allocation5], %s435_s19, %s435_s19, %s436_s20  }
  0xd1   :  { %429 = dma.done.wait [#allocation5], 1024  }
  0xd2   :  { %430 = vsyncadd [#allocation5], 4294966272 }
  0xd3   :  { %268 = vsyncpa [#allocation4], 1 }
  0xd4   :  { %269 = vsyncpa [#allocation5], 1 }

</bundles_post_ra>
